<compile_context>
chip_gen: v7x
topology: tpu7x:2x2x1
jax: 0.10.0
libtpu: 0.0.40
codegen_flags: <defaults>
</compile_context>

<pallas_src>
import jax
import jax.numpy as jnp
from jax.experimental import pallas as pl
from jax.experimental.pallas import tpu as pltpu

SUBLANE = 8  # TPU sublane width: batch tiles / batch padding are multiples of 8


def _round_up(n, m):
    return ((n + m - 1) // m) * m


def actor_kernel(x_ref, w1_ref, b1_ref, w2_ref, b2_ref, w3_ref, b3_ref, o_ref):
    # fc1 + ReLU
    h1 = jnp.dot(x_ref[...], w1_ref[...], preferred_element_type=jnp.float32) + b1_ref[...]
    h1 = jnp.maximum(h1, 0.0)
    # fc2 + ReLU
    h2 = jnp.dot(h1, w2_ref[...], preferred_element_type=jnp.float32) + b2_ref[...]
    h2 = jnp.maximum(h2, 0.0)
    # out + Tanh (action_dim-wide store; masked vst is far cheaper than 128-lane padding)
    y = jnp.dot(h2, w3_ref[...], preferred_element_type=jnp.float32) + b3_ref[...]
    o_ref[...] = jnp.tanh(y).astype(o_ref.dtype)


def actor_forward(state, params, *, max_batch_tile=2048):
    """state: (B, state_dim) float array.

    params must be kernel-ready (prepared ONCE, outside the hot path):
      w1 (state_dim, 64), b1 (1, 64), w2 (64, 64), b2 (1, 64),
      w3 (64, action_dim), b3 (1, action_dim), all float32.
    (PyTorch nn.Linear stores weight as (out, in): transpose once when importing.)
    """
    B, state_dim = state.shape
    action_dim = params["w3"].shape[1]
    f32 = jnp.float32

    # Pad batch only to a sublane multiple (often a no-op); no lane padding at all.
    B_p = _round_up(B, SUBLANE)
    x = state.astype(f32)
    if B_p != B:
        x = jnp.pad(x, ((0, B_p - B), (0, 0)))

    TB = min(max_batch_tile, B_p)              # multiple of 8 by construction
    grid = (pl.cdiv(B_p, TB),)                 # ragged last block is masked by Pallas

    def resident(a):
        # Full-array block + constant index_map -> stays VMEM-resident across the grid
        # (Pallas skips re-DMA when the block index does not change).
        return pl.BlockSpec(a.shape, lambda i: (0,) * a.ndim)

    out_p = pl.pallas_call(
        actor_kernel,
        out_shape=jax.ShapeDtypeStruct((B_p, action_dim), f32),
        grid=grid,
        in_specs=[
            pl.BlockSpec((TB, state_dim), lambda i: (i, 0)),   # batch-tiled activations
            resident(params["w1"]), resident(params["b1"]),
            resident(params["w2"]), resident(params["b2"]),
            resident(params["w3"]), resident(params["b3"]),
        ],
        out_specs=pl.BlockSpec((TB, action_dim), lambda i: (i, 0)),
        compiler_params=pltpu.CompilerParams(
            # TODO(synk): on v7x, use pltpu.CORE_PARALLEL (with >=2 batch tiles) to
            # actually shard the batch axis across both TensorCores; plain "parallel"
            # is kept here for portability to single-TC v5e/v6e.
            dimension_semantics=("parallel",),
        ),
    )(x, params["w1"], params["b1"], params["w2"], params["b2"],
      params["w3"], params["b3"])

    return out_p[:B] if B_p != B else out_p


def init_actor_params(key, state_dim, action_dim, hidden=64):
    """One-time parameter prep: kernel-ready layout ((in,out) weights, (1,out) biases),
    mimicking PyTorch's default uniform(-1/sqrt(fan_in), 1/sqrt(fan_in)) init."""
    def linear(key, fan_in, fan_out):
        kw, kb = jax.random.split(key)
        bound = 1.0 / jnp.sqrt(fan_in)
        w = jax.random.uniform(kw, (fan_in, fan_out), jnp.float32, -bound, bound)
        b = jax.random.uniform(kb, (1, fan_out), jnp.float32, -bound, bound)
        return w, b

    k1, k2, k3 = jax.random.split(key, 3)
    w1, b1 = linear(k1, state_dim, hidden)
    w2, b2 = linear(k2, hidden, hidden)
    w3, b3 = linear(k3, hidden, action_dim)
    return {"w1": w1, "b1": b1, "w2": w2, "b2": b2, "w3": w3, "b3": b3}


def actor_reference(state, params):
    """Pure-JAX reference for correctness checks."""
    h1 = jax.nn.relu(state @ params["w1"] + params["b1"])
    h2 = jax.nn.relu(h1 @ params["w2"] + params["b2"])
    return jnp.tanh(h2 @ params["w3"] + params["b3"])


if __name__ == "__main__":
    key = jax.random.PRNGKey(0)
    k_params, k_state = jax.random.split(key)

    batch, state_dim, action_dim = 2, 8, 4
    params = init_actor_params(k_params, state_dim, action_dim, hidden=64)
    state = jax.random.normal(k_state, (batch, state_dim), jnp.float32)

    out = jax.block_until_ready(actor_forward(state, params))
    ref = actor_reference(state, params)
    assert out.shape == (batch, action_dim)
    assert jnp.allclose(out, ref, atol=1e-5, rtol=1e-5), "mismatch vs reference"

    # Large batch, single big tile (default TB), batch padded 1037 -> 1040.
    big_state = jax.random.normal(k_state, (1037, state_dim), jnp.float32)
    big_out = jax.block_until_ready(actor_forward(big_state, params))
    big_ref = actor_reference(big_state, params)
    assert big_out.shape == (1037, action_dim)
    assert jnp.allclose(big_out, big_ref, atol=1e-5, rtol=1e-5), "mismatch vs reference (big batch)"

    # Multi-step grid with a ragged last block (exercises the cdiv/masked-write path).
    tiled_out = jax.block_until_ready(actor_forward(big_state, params, max_batch_tile=64))
    assert jnp.allclose(tiled_out, big_ref, atol=1e-5, rtol=1e-5), "mismatch vs reference (tiled)"

    print("KERNEL_OK")
</pallas_src>

<mosaic_0001>
module attributes {stable_mosaic.version = 11 : i64} {
  func.func @actor_kernel(%arg0: i32, %arg1: memref<8x8xf32, #tpu.memory_space<vmem>>, %arg2: memref<8x64xf32, #tpu.memory_space<vmem>>, %arg3: memref<1x64xf32, #tpu.memory_space<vmem>>, %arg4: memref<64x64xf32, #tpu.memory_space<vmem>>, %arg5: memref<1x64xf32, #tpu.memory_space<vmem>>, %arg6: memref<64x4xf32, #tpu.memory_space<vmem>>, %arg7: memref<1x4xf32, #tpu.memory_space<vmem>>, %arg8: memref<8x4xf32, #tpu.memory_space<vmem>>) attributes {dimension_semantics = [#tpu.dimension_semantics<parallel>], iteration_bounds = array<i64: 1>, scalar_prefetch = 0 : i64, scratch_operands = 0 : i64, tpu.core_type = #tpu.core_type<tc>, window_params = [{transform_indices = @transform_0, window_bounds = array<i64: 8, 8>}, {pipeline_mode = #tpu.pipeline_mode<synchronous>, transform_indices = @transform_1, window_bounds = array<i64: 8, 64>}, {pipeline_mode = #tpu.pipeline_mode<synchronous>, transform_indices = @transform_2, window_bounds = array<i64: 1, 64>}, {pipeline_mode = #tpu.pipeline_mode<synchronous>, transform_indices = @transform_3, window_bounds = array<i64: 64, 64>}, {pipeline_mode = #tpu.pipeline_mode<synchronous>, transform_indices = @transform_4, window_bounds = array<i64: 1, 64>}, {pipeline_mode = #tpu.pipeline_mode<synchronous>, transform_indices = @transform_5, window_bounds = array<i64: 64, 4>}, {pipeline_mode = #tpu.pipeline_mode<synchronous>, transform_indices = @transform_6, window_bounds = array<i64: 1, 4>}, {transform_indices = @transform_7, window_bounds = array<i64: 8, 4>}]} {
    %c0 = arith.constant 0 : index
    %c0_0 = arith.constant 0 : index
    %0 = vector.load %arg1[%c0, %c0_0] : memref<8x8xf32, #tpu.memory_space<vmem>>, vector<8x8xf32>
    %c0_1 = arith.constant 0 : index
    %c0_2 = arith.constant 0 : index
    %1 = vector.load %arg2[%c0_1, %c0_2] : memref<8x64xf32, #tpu.memory_space<vmem>>, vector<8x64xf32>
    %cst = arith.constant dense<0.000000e+00> : vector<8x64xf32>
    %2 = tpu.matmul %0, %1, %cst {dimension_numbers = #tpu.dot_dimension_numbers<[1], [0], [0], [1], [0, 0, 1, 1], [], []>} : vector<8x8xf32>, vector<8x64xf32>, vector<8x64xf32> -> vector<8x64xf32>
    %c0_3 = arith.constant 0 : index
    %c0_4 = arith.constant 0 : index
    %3 = vector.load %arg3[%c0_3, %c0_4] : memref<1x64xf32, #tpu.memory_space<vmem>>, vector<1x64xf32>
    %4 = vector.broadcast %3 : vector<1x64xf32> to vector<8x64xf32>
    %5 = arith.addf %2, %4 : vector<8x64xf32>
    %cst_5 = arith.constant 0.000000e+00 : f32
    %6 = vector.broadcast %cst_5 : f32 to vector<8x64xf32>
    %7 = arith.maximumf %5, %6 : vector<8x64xf32>
    %c0_6 = arith.constant 0 : index
    %c0_7 = arith.constant 0 : index
    %8 = vector.load %arg4[%c0_6, %c0_7] : memref<64x64xf32, #tpu.memory_space<vmem>>, vector<64x64xf32>
    %cst_8 = arith.constant dense<0.000000e+00> : vector<8x64xf32>
    %9 = tpu.matmul %7, %8, %cst_8 {dimension_numbers = #tpu.dot_dimension_numbers<[1], [0], [0], [1], [0, 0, 1, 1], [], []>} : vector<8x64xf32>, vector<64x64xf32>, vector<8x64xf32> -> vector<8x64xf32>
    %c0_9 = arith.constant 0 : index
    %c0_10 = arith.constant 0 : index
    %10 = vector.load %arg5[%c0_9, %c0_10] : memref<1x64xf32, #tpu.memory_space<vmem>>, vector<1x64xf32>
    %11 = vector.broadcast %10 : vector<1x64xf32> to vector<8x64xf32>
    %12 = arith.addf %9, %11 : vector<8x64xf32>
    %cst_11 = arith.constant 0.000000e+00 : f32
    %13 = vector.broadcast %cst_11 : f32 to vector<8x64xf32>
    %14 = arith.maximumf %12, %13 : vector<8x64xf32>
    %c0_12 = arith.constant 0 : index
    %c0_13 = arith.constant 0 : index
    %15 = vector.load %arg6[%c0_12, %c0_13] : memref<64x4xf32, #tpu.memory_space<vmem>>, vector<64x4xf32>
    %cst_14 = arith.constant dense<0.000000e+00> : vector<8x4xf32>
    %16 = tpu.matmul %14, %15, %cst_14 {dimension_numbers = #tpu.dot_dimension_numbers<[1], [0], [0], [1], [0, 0, 1, 1], [], []>} : vector<8x64xf32>, vector<64x4xf32>, vector<8x4xf32> -> vector<8x4xf32>
    %c0_15 = arith.constant 0 : index
    %c0_16 = arith.constant 0 : index
    %17 = vector.load %arg7[%c0_15, %c0_16] : memref<1x4xf32, #tpu.memory_space<vmem>>, vector<1x4xf32>
    %18 = vector.broadcast %17 : vector<1x4xf32> to vector<8x4xf32>
    %19 = arith.addf %16, %18 : vector<8x4xf32>
    %20 = math.tanh %19 : vector<8x4xf32>
    %c0_17 = arith.constant 0 : index
    %c0_18 = arith.constant 0 : index
    %21 = vector.load %arg8[%c0_17, %c0_18] : memref<8x4xf32, #tpu.memory_space<vmem>>, vector<8x4xf32>
    tpu.vector_store %arg8[%c0_17, %c0_18], %20 {strides = array<i32>} : memref<8x4xf32, #tpu.memory_space<vmem>>, vector<8x4xf32>,
    return
  }
  func.func @transform_0(%arg0: i32) -> (i32, i32) {
    %c0_i32 = arith.constant 0 : i32
    %c0_i32_0 = arith.constant 0 : i32
    return %arg0, %c0_i32 : i32, i32
  }
  func.func @transform_1(%arg0: i32) -> (i32, i32) {
    %c0_i32 = arith.constant 0 : i32
    %c0_i32_0 = arith.constant 0 : i32
    %c0_i32_1 = arith.constant 0 : i32
    return %c0_i32, %c0_i32_0 : i32, i32
  }
  func.func @transform_2(%arg0: i32) -> (i32, i32) {
    %c0_i32 = arith.constant 0 : i32
    %c0_i32_0 = arith.constant 0 : i32
    %c0_i32_1 = arith.constant 0 : i32
    return %c0_i32, %c0_i32_0 : i32, i32
  }
  func.func @transform_3(%arg0: i32) -> (i32, i32) {
    %c0_i32 = arith.constant 0 : i32
    %c0_i32_0 = arith.constant 0 : i32
    %c0_i32_1 = arith.constant 0 : i32
    return %c0_i32, %c0_i32_0 : i32, i32
  }
  func.func @transform_4(%arg0: i32) -> (i32, i32) {
    %c0_i32 = arith.constant 0 : i32
    %c0_i32_0 = arith.constant 0 : i32
    %c0_i32_1 = arith.constant 0 : i32
    return %c0_i32, %c0_i32_0 : i32, i32
  }
  func.func @transform_5(%arg0: i32) -> (i32, i32) {
    %c0_i32 = arith.constant 0 : i32
    %c0_i32_0 = arith.constant 0 : i32
    %c0_i32_1 = arith.constant 0 : i32
    return %c0_i32, %c0_i32_0 : i32, i32
  }
  func.func @transform_6(%arg0: i32) -> (i32, i32) {
    %c0_i32 = arith.constant 0 : i32
    %c0_i32_0 = arith.constant 0 : i32
    %c0_i32_1 = arith.constant 0 : i32
    return %c0_i32, %c0_i32_0 : i32, i32
  }
  func.func @transform_7(%arg0: i32) -> (i32, i32) {
    %c0_i32 = arith.constant 0 : i32
    %c0_i32_0 = arith.constant 0 : i32
    return %arg0, %c0_i32 : i32, i32
  }
}

</mosaic_0001>

<bundles_post_ra>
// kernel: tpu_custom_call.1
= control target key start
LH: loop header
LB: loop body
LE: loop exit
PB: predicated region body
PF: predicated region fallthrough
CT: control target
= control target key end

     0   :  { %12 = vsyncpa [#allocation3], 0  ;;  %s431_s24 = smov [#allocation2]   ;;  %s553_s0 = inlined_call_operand.vmem [shape: f32[8,8], index: 0, kind: input, shape index: {}]   ;;  %s554_s1 = inlined_call_operand.hbm [shape: f32[8,64], index: 1, kind: input, shape index: {}]   ;;  %s555_s2 = inlined_call_operand.vmem [shape: f32[1,64], index: 2, kind: input, shape index: {}]   ;;  %s556_s3 = inlined_call_operand.vmem [shape: f32[64,64], index: 3, kind: input, shape index: {}]   ;;  %s557_s4 = inlined_call_operand.vmem [shape: f32[1,64], index: 4, kind: input, shape index: {}]   ;;  %s558_s5 = inlined_call_operand.vmem [shape: f32[64,4], index: 5, kind: input, shape index: {}]   ;;  %s559_s6 = inlined_call_operand.vmem [shape: f32[1,4], index: 6, kind: input, shape index: {}]   ;;  %s560_s7 = inlined_call_operand.vmem [shape: f32[8,4], index: 7, kind: output, shape index: {}]  }
   0x1   :  { %s21_s25 = sshll.u32 %s431_s24, 4  ;;  %s407_s28 = scalar_lea.hbm %s554_s1, 128  ;;  %s22_s25 = int_to_ptr.vmem [resolvable:$true] %s21_s25 }
   0x2   :  { %p408_p0 = scmp.ne.s32.totalorder %s554_s1, %s407_s28  ;;  %p411_p1 = scmp.lt.u32.totalorder %s407_s28, %s554_s1 }
   0x4   :  { %p413_p2 = pnand %p411_p1, %p408_p0 }
   0x6   :  { %416 = shalt.err (!%p413_p2)
}
   0x7   :  { %s417_s10 = scalar_lea.vmem %s22_s25, 128  ;;  %p422_p4 = scmp.lt.s32.totalorder %s22_s25, %s22_s25 }
   0x8   :  { %p418_p3 = scmp.ne.s32.totalorder %s22_s25, %s417_s10  ;;  %p423_p5 = scmp.lt.s32.totalorder %s417_s10, %s417_s10 }
   0xa   :  { %p424_p6 = por %p423_p5, %p422_p4 }
   0xc   :  { %p425_p7 = pnand %p424_p6, %p418_p3 }
   0xe   :  { %428 = shalt.err (!%p425_p7)
}
   0xf   :  { %24 = dma.hbm_to_vmem [thread:$0]  %s554_s1, 128, %s22_s25, [#allocation3]  }
  0x10   :  { %429 = dma.done.wait [#allocation3], 128  }
  0x11   :  { %430 = vsyncadd [#allocation3], 4294967168  ;;  %v432_v0 = vmov 0.0   ;;  %vm433_vm0 = vmmov 0   ;;  %v434_v1 = vmov 0.0|0.0   ;;  %vm47_vm1 = vcmask 64512  }
  0x12   :  { %334 = vmatprep.subr.mxu0 %v432_v0  ;;  %336 = vmatprep.mubr.msk.f32.mxu0 %vm433_vm0, %v432_v0  ;;  %v39_v2 = vld [vmem:[#allocation2] sm:$0xff]  ;;  %v123_v5 = vld [vmem:[%s556_s3 + $0x8] sm:$0xff]  ;;  %v124_v6 = vld [vmem:[%s556_s3 + $0x10] sm:$0xff]  ;;  %vm137_vm2 = vcmask 523264   ;;  %vm301_vm3 = vcmask 31744  }
  0x13   :  { %377 = vmatprep.subr.bf16.mxu1 %v434_v1  ;;  %355 = vmatprep.mubr.msk.f32.mxu1 %vm433_vm0, %v432_v0  ;;  %v38_v3 = vld [vmem:[%s553_s0] sm:$0xff]  ;;  %v125_v7 = vld [vmem:[%s556_s3 + $0x18] sm:$0xff]  ;;  %v127_v11 = vld [vmem:[%s556_s3 + $0x28] sm:$0xff] }
  0x14   :  { %v122_v4 = vld [vmem:[%s556_s3] sm:$0xff]  ;;  %335 = vmatpush3.msra.mxu0 %v39_v2  ;;  %v381_v9 = vpack.c.bf16 %v125_v7, %v124_v6  ;;  %v128_v13 = vld [vmem:[%s556_s3 + $0x30] sm:$0xff]  ;;  %v129_v14 = vld [vmem:[%s556_s3 + $0x38] sm:$0xff] }
  0x15   :  { %337 = vmatmul.mubr.msk.f32.vlgmr.msra.gmra.mrb[0].mxu0 %vm47_vm1, %v38_v3  ;;  %v378_v8 = vpack.c.bf16 %v123_v5, %v122_v4  ;;  %389 = vmatprep.subr.bf16.mxu0 %v434_v1  ;;  %v126_v10 = vld [vmem:[%s556_s3 + $0x20] sm:$0xff]  ;;  %v387_v15 = vpack.c.bf16 %v129_v14, %v128_v13  ;;  %v213_v17 = vld [vmem:[%s558_s5 + $0x8] sm:$0xff]  ;;  %v214_v18 = vld [vmem:[%s558_s5 + $0x10] sm:$0xff] }
  0x16   :  { %374 = vmatprep.mubr.msk.f32.mxu0 %vm433_vm0, %v432_v0  ;;  %v384_v12 = vpack.c.bf16 %v127_v11, %v126_v10  ;;  %v212_v16 = vld [vmem:[%s558_s5] sm:$0xff]  ;;  %v215_v20 = vld [vmem:[%s558_s5 + $0x18] sm:$0xff]  ;;  %v217_v23 = vld [vmem:[%s558_s5 + $0x28] sm:$0xff] }
  0x17   :  { %379 = vmatpush3.bf16.msra.mxu1 %v378_v8  ;;  %v390_v19 = vpack.c.bf16 %v213_v17, %v212_v16  ;;  %v393_v21 = vpack.c.bf16 %v215_v20, %v214_v18  ;;  %v216_v22 = vld [vmem:[%s558_s5 + $0x20] sm:$0xff]  ;;  %v218_v30 = vld [vmem:[%s558_s5 + $0x30] sm:$0xff]  ;;  %v219_v31 = vld [vmem:[%s558_s5 + $0x38] sm:$0xff] }
  0x18   :  { %380 = vmatprep.subr.bf16.mxu1 %v434_v1  ;;  %v396_v24 = vpack.c.bf16 %v217_v23, %v216_v22  ;;  %v308_v25 = vld [vmem:[%s555_s2] ss:$0 sm:$0xff]  ;;  %v399_v32 = vpack.c.bf16 %v219_v31, %v218_v30 }
  0x19   :  { %391 = vmatpush3.bf16.msra.mxu0 %v390_v19  ;;  %v310_v33 = vld [vmem:[%s557_s4] ss:$0 sm:$0xff] }
  0x1a   :  { %392 = vmatprep.subr.bf16.mxu0 %v434_v1  ;;  %v312_v38 = vld [vmem:[%s559_s6] ss:$0 sm:$0xff] }
  0x1b   :  { %382 = vmatpush3.bf16.msra.mxu1 %v381_v9 }
  0x1c   :  { %383 = vmatprep.subr.bf16.mxu1 %v434_v1 }
  0x1d   :  { %394 = vmatpush3.bf16.msra.mxu0 %v393_v21 }
  0x1e   :  { %395 = vmatprep.subr.bf16.mxu0 %v434_v1 }
  0x1f   :  { %385 = vmatpush3.bf16.msra.mxu1 %v384_v12 }
  0x20   :  { %386 = vmatprep.subr.bf16.mxu1 %v434_v1 }
  0x21   :  { %397 = vmatpush3.bf16.msra.mxu0 %v396_v24 }
  0x22   :  { %398 = vmatprep.subr.bf16.mxu0 %v434_v1 }
  0x23   :  { %388 = vmatpush3.bf16.msra.mxu1 %v387_v15 }
  0x25   :  { %400 = vmatpush3.bf16.msra.mxu0 %v399_v32 }
  0xe8   :  { %v117_v26 = vpop.f32.mrb[0].mxu0 }
  0xe9   :  { %v118_v27 = vadd.f32 %v308_v25, %v117_v26  ;;  %v338_v28 = vpop.f32.mrb[1].mxu0 }
  0xeb   :  { %v121_v29 = vmax.f32 %v118_v27, 0.0 }
  0xed   :  { %356 = vmatmul.mubr.msk.f32.vlgmr.msra.gmra.mrb[0].mxu1 %vm137_vm2, %v121_v29 }
 0x1c0   :  { %v207_v34 = vpop.f32.mrb[0].mxu1 }
 0x1c1   :  { %v208_v35 = vadd.f32 %v310_v33, %v207_v34  ;;  %v357_v36 = vpop.f32.mrb[1].mxu1 }
 0x1c3   :  { %v211_v37 = vmax.f32 %v208_v35, 0.0 }
 0x1c5   :  { %375 = vmatmul.mubr.msk.f32.vlgmr.msra.gmra.mrb[2].mxu0 %vm137_vm2, %v211_v37 }
 0x298   :  { %v296_v39 = vpop.f32.mrb[2].mxu0 }
 0x299   :  { %v297_v40 = vadd.f32 %v312_v38, %v296_v39  ;;  %v376_v41 = vpop.f32.mrb[3].mxu0 }
 0x29b   :  { %405 = vtanh.f32 %v297_v40 }
 0x2a5   :  { %v406_v42 = vpop.eup %405 }
 0x2a6   :  { %302 = vst.msk [vmem:[%s560_s7] sm:$0xff] %vm301_vm3, %v406_v42 }
 0x2a7   :  { %307 = vsyncpa [#allocation3], 1 }

</bundles_post_ra>
